<compile_context>
chip_gen: v6e
topology: v6e:2x2x1
jax: 0.10.0
libtpu: 0.0.40
codegen_flags: <defaults>
</compile_context>

<pallas_src>
import functools

import jax
import jax.numpy as jnp
from jax.experimental import pallas as pl
from jax.experimental.pallas import tpu as pltpu


def encoder_kernel(self_ref, neigh_ref, w_self_ref, w_neigh_ref, out_ref):
    # self_ref/neigh_ref: (TILE_N, F)   w_*_ref: (F, E)   out_ref: (TILE_N, E)
    acc = jnp.dot(self_ref[...], w_self_ref[...], preferred_element_type=jnp.float32)
    acc = acc + jnp.dot(neigh_ref[...], w_neigh_ref[...],
                        preferred_element_type=jnp.float32)
    out_ref[...] = jnp.maximum(acc, 0.0).astype(out_ref.dtype)


@functools.partial(jax.jit, static_argnames=("tile_n", "compute_dtype"))
def encoder_forward(neigh_feats, self_feats, weight, *,
                    tile_n=512, compute_dtype=jnp.bfloat16):
    """relu(cat([self_feats, neigh_feats], dim=1) @ weight) via a Pallas kernel."""
    n, feat_dim = self_feats.shape
    two_f, embed_dim = weight.shape
    assert two_f == 2 * feat_dim
    assert neigh_feats.shape == (n, feat_dim)

    # Split the weight in the wrapper (concat order is [self, neigh]).
    w_self = weight[:feat_dim].astype(compute_dtype)
    w_neigh = weight[feat_dim:].astype(compute_dtype)
    self_c = self_feats.astype(compute_dtype)
    neigh_c = neigh_feats.astype(compute_dtype)

    # Pad the node dim so every block is a full (8-sublane-aligned) tile.
    n_sub = ((n + 7) // 8) * 8                      # sublane-align
    tile = min(tile_n, n_sub)
    tile = ((tile + 7) // 8) * 8                    # tile itself multiple of 8
    n_pad = ((n_sub + tile - 1) // tile) * tile     # whole number of tiles
    if n_pad != n:
        pad = [(0, n_pad - n), (0, 0)]
        self_c = jnp.pad(self_c, pad)
        neigh_c = jnp.pad(neigh_c, pad)

    grid = (n_pad // tile,)

    out = pl.pallas_call(
        encoder_kernel,
        out_shape=jax.ShapeDtypeStruct((n_pad, embed_dim), jnp.float32),
        grid_spec=pltpu.PrefetchScalarGridSpec(
            num_scalar_prefetch=0,
            grid=grid,
            in_specs=[
                pl.BlockSpec((tile, feat_dim), lambda i: (i, 0)),       # self tile
                pl.BlockSpec((tile, feat_dim), lambda i: (i, 0)),       # neigh tile
                pl.BlockSpec((feat_dim, embed_dim), lambda i: (0, 0)),  # W_self (resident)
                pl.BlockSpec((feat_dim, embed_dim), lambda i: (0, 0)),  # W_neigh (resident)
            ],
            out_specs=pl.BlockSpec((tile, embed_dim), lambda i: (i, 0)),
        ),
        compiler_params=pltpu.CompilerParams(
            # Node tiles are independent -> shard across TensorCores on v7x.
            dimension_semantics=("parallel",),
        ),
    )(self_c, neigh_c, w_self, w_neigh)

    return out[:n] if n_pad != n else out
    # TODO(synk): for very large F add a K-axis grid with an f32 accumulator
    # scratch (pl.when init/epilogue) so weight panels stream instead of
    # staying fully resident.


def xavier_uniform(key, shape, dtype=jnp.float32):
    fan_in, fan_out = shape
    bound = jnp.sqrt(6.0 / (fan_in + fan_out))
    return jax.random.uniform(key, shape, dtype=dtype, minval=-bound, maxval=bound)


if __name__ == "__main__":
    feature_dim = 32
    embed_dim = 32
    n_nodes = 200          # not a multiple of the tile -> exercises padding path
    demo_tile = 64         # small tile so the demo runs a multi-step grid

    key = jax.random.PRNGKey(0)
    k_w, k_neigh, k_self = jax.random.split(key, 3)

    weight = xavier_uniform(k_w, (2 * feature_dim, embed_dim))
    neigh_feats = jax.random.normal(k_neigh, (n_nodes, feature_dim), dtype=jnp.float32)
    self_feats = jax.random.normal(k_self, (n_nodes, feature_dim), dtype=jnp.float32)

    # --- strict check: f32 compute path against the exact PyTorch-equivalent ref ---
    out_f32 = encoder_forward(neigh_feats, self_feats, weight,
                              tile_n=demo_tile, compute_dtype=jnp.float32)
    out_f32 = jax.block_until_ready(out_f32)
    ref_f32 = jnp.maximum(
        jnp.concatenate([self_feats, neigh_feats], axis=1) @ weight, 0.0)
    assert out_f32.shape == (n_nodes, embed_dim)
    assert jnp.allclose(out_f32, ref_f32, atol=1e-5, rtol=1e-5)

    # --- perf path: bf16 inputs, f32 accumulation (default config) ---
    out_bf16 = encoder_forward(neigh_feats, self_feats, weight, tile_n=demo_tile)
    out_bf16 = jax.block_until_ready(out_bf16)
    # Reference with the same bf16 input rounding, accumulated in f32.
    s_b = self_feats.astype(jnp.bfloat16).astype(jnp.float32)
    n_b = neigh_feats.astype(jnp.bfloat16).astype(jnp.float32)
    w_b = weight.astype(jnp.bfloat16).astype(jnp.float32)
    ref_bf16 = jnp.maximum(jnp.concatenate([s_b, n_b], axis=1) @ w_b, 0.0)
    assert out_bf16.shape == (n_nodes, embed_dim)
    assert jnp.allclose(out_bf16, ref_bf16, atol=1e-3, rtol=1e-3)

    print("KERNEL_OK")
</pallas_src>

<mosaic_0001>
module attributes {stable_mosaic.version = 11 : i64} {
  func.func @encoder_kernel(%arg0: i32, %arg1: memref<64x32xf32, #tpu.memory_space<vmem>>, %arg2: memref<64x32xf32, #tpu.memory_space<vmem>>, %arg3: memref<32x32xf32, #tpu.memory_space<vmem>>, %arg4: memref<32x32xf32, #tpu.memory_space<vmem>>, %arg5: memref<64x32xf32, #tpu.memory_space<vmem>>) attributes {dimension_semantics = [#tpu.dimension_semantics<parallel>], iteration_bounds = array<i64: 4>, scalar_prefetch = 0 : i64, scratch_operands = 0 : i64, tpu.core_type = #tpu.core_type<tc>, window_params = [{transform_indices = @transform_0, window_bounds = array<i64: 64, 32>}, {transform_indices = @transform_1, window_bounds = array<i64: 64, 32>}, {pipeline_mode = #tpu.pipeline_mode<synchronous>, transform_indices = @transform_2, window_bounds = array<i64: 32, 32>}, {pipeline_mode = #tpu.pipeline_mode<synchronous>, transform_indices = @transform_3, window_bounds = array<i64: 32, 32>}, {transform_indices = @transform_4, window_bounds = array<i64: 64, 32>}]} {
    %c0 = arith.constant 0 : index
    %c0_0 = arith.constant 0 : index
    %0 = vector.load %arg1[%c0, %c0_0] : memref<64x32xf32, #tpu.memory_space<vmem>>, vector<64x32xf32>
    %c0_1 = arith.constant 0 : index
    %c0_2 = arith.constant 0 : index
    %1 = vector.load %arg3[%c0_1, %c0_2] : memref<32x32xf32, #tpu.memory_space<vmem>>, vector<32x32xf32>
    %cst = arith.constant dense<0.000000e+00> : vector<64x32xf32>
    %2 = tpu.matmul %0, %1, %cst {dimension_numbers = #tpu.dot_dimension_numbers<[1], [0], [0], [1], [0, 0, 1, 1], [], []>} : vector<64x32xf32>, vector<32x32xf32>, vector<64x32xf32> -> vector<64x32xf32>
    %c0_3 = arith.constant 0 : index
    %c0_4 = arith.constant 0 : index
    %3 = vector.load %arg2[%c0_3, %c0_4] : memref<64x32xf32, #tpu.memory_space<vmem>>, vector<64x32xf32>
    %c0_5 = arith.constant 0 : index
    %c0_6 = arith.constant 0 : index
    %4 = vector.load %arg4[%c0_5, %c0_6] : memref<32x32xf32, #tpu.memory_space<vmem>>, vector<32x32xf32>
    %cst_7 = arith.constant dense<0.000000e+00> : vector<64x32xf32>
    %5 = tpu.matmul %3, %4, %cst_7 {dimension_numbers = #tpu.dot_dimension_numbers<[1], [0], [0], [1], [0, 0, 1, 1], [], []>} : vector<64x32xf32>, vector<32x32xf32>, vector<64x32xf32> -> vector<64x32xf32>
    %6 = arith.addf %2, %5 : vector<64x32xf32>
    %cst_8 = arith.constant 0.000000e+00 : f32
    %7 = vector.broadcast %cst_8 : f32 to vector<64x32xf32>
    %8 = arith.maximumf %6, %7 : vector<64x32xf32>
    %c0_9 = arith.constant 0 : index
    %c0_10 = arith.constant 0 : index
    %9 = vector.load %arg5[%c0_9, %c0_10] : memref<64x32xf32, #tpu.memory_space<vmem>>, vector<64x32xf32>
    tpu.vector_store %arg5[%c0_9, %c0_10], %8 {strides = array<i32>} : memref<64x32xf32, #tpu.memory_space<vmem>>, vector<64x32xf32>,
    return
  }
  func.func @transform_0(%arg0: i32) -> (i32, i32) {
    %c0_i32 = arith.constant 0 : i32
    %c0_i32_0 = arith.constant 0 : i32
    return %arg0, %c0_i32 : i32, i32
  }
  func.func @transform_1(%arg0: i32) -> (i32, i32) {
    %c0_i32 = arith.constant 0 : i32
    %c0_i32_0 = arith.constant 0 : i32
    return %arg0, %c0_i32 : i32, i32
  }
  func.func @transform_2(%arg0: i32) -> (i32, i32) {
    %c0_i32 = arith.constant 0 : i32
    %c0_i32_0 = arith.constant 0 : i32
    %c0_i32_1 = arith.constant 0 : i32
    return %c0_i32, %c0_i32_0 : i32, i32
  }
  func.func @transform_3(%arg0: i32) -> (i32, i32) {
    %c0_i32 = arith.constant 0 : i32
    %c0_i32_0 = arith.constant 0 : i32
    %c0_i32_1 = arith.constant 0 : i32
    return %c0_i32, %c0_i32_0 : i32, i32
  }
  func.func @transform_4(%arg0: i32) -> (i32, i32) {
    %c0_i32 = arith.constant 0 : i32
    %c0_i32_0 = arith.constant 0 : i32
    return %arg0, %c0_i32 : i32, i32
  }
}

</mosaic_0001>

<bundles_post_ra>
// kernel: encoder_forward.1
= control target key start
LH: loop header
LB: loop body
LE: loop exit
PB: predicated region body
PF: predicated region fallthrough
CT: control target
= control target key end

     0   :  { %s724_s15 = smov 0   ;;  %s827_s0 = inlined_call_operand.vmem [shape: f32[256,32], index: 0, kind: input, shape index: {}]   ;;  %s828_s1 = inlined_call_operand.vmem [shape: f32[256,32], index: 1, kind: input, shape index: {}]   ;;  %s829_s2 = inlined_call_operand.vmem [shape: f32[32,32], index: 2, kind: input, shape index: {}]   ;;  %s830_s3 = inlined_call_operand.vmem [shape: f32[32,32], index: 3, kind: input, shape index: {}]   ;;  %s831_s4 = inlined_call_operand.vmem [shape: f32[256,32], index: 4, kind: output, shape index: {}]  }
   0x1 LB: > { %s590_s16 = sadd.s32 4294967295, %s697_s15   ;;  %p594_p0 = scmp.ge.s32.totalorder %s697_s15, 1  ;;  %s697_s15 = sphi %s724_s15, %s14_s15  }
   0x2   : > { %p174_p1 = scmp.lt.s32.totalorder %s697_s15, 5 }
   0x4   : > { %p175_p2 = pnand %p594_p0, %p174_p1 }
   0x5   : > { %s595_s23 = sshll.u32 (!%p175_p2), %s590_s16, 3 }
   0x6   : > { %178 = sbr.rel (%p175_p2) target bundleno = 234 (0xea), region = 36  ;;  %p206_p3 = scmp.lt.s32.totalorder (!%p175_p2), %s595_s23, 31 }
   0xb   : > { %v246_v0 = vld [vmem:[%s830_s3 + $0x18] sm:$0xff]  ;;  %v245_v2 = vld [vmem:[%s830_s3 + $0x10] sm:$0xff]  ;;  %v244_v4 = vld [vmem:[%s830_s3 + $0x8] sm:$0xff]  ;;  %s833_s23 = smov (!%p206_p3, %s595_s23), 31  ;;  %vm247_vm0 = vcmask 261120  }
   0xc   : > { %v234_v1 = vld [vmem:[%s829_s2 + $0x18] sm:$0xff]  ;;  %643 = vmatprep.subr.mxu0 %v246_v0  ;;  %v233_v3 = vld [vmem:[%s829_s2 + $0x10] sm:$0xff]  ;;  %v232_v5 = vld [vmem:[%s829_s2 + $0x8] sm:$0xff]  ;;  %s756_s8 = sshll.u32 %s833_s23, 3 }
   0xd   : > { %663 = vmatprep.subr.mxu1 %v234_v1  ;;  %644 = vmatpush3.msra.mxu0 %v246_v0  ;;  %v243_v6 = vld [vmem:[%s830_s3] sm:$0xff]  ;;  %s762_s11 = scalar_lea.vmem %s828_s1, %s756_s8  ;;  %s769_s14 = scalar_lea.vmem %s827_s0, %s756_s8 }
   0xe   : > { %664 = vmatpush3.msra.mxu1 %v234_v1  ;;  %645 = vmatprep.subr.mxu0 %v245_v2  ;;  %v231_v7 = vld [vmem:[%s829_s2] sm:$0xff]  ;;  %v236_v9 = vld [vmem:[%s762_s11 + $0x8] sm:$0xff]  ;;  %v237_v10 = vld [vmem:[%s762_s11 + $0x10] sm:$0xff]  ;;  %s806_s18 = scalar_lea.vmem %s831_s4, %s756_s8 }
   0xf   : > { %665 = vmatprep.subr.mxu1 %v233_v3  ;;  %646 = vmatpush3.msra.mxu0 %v245_v2  ;;  %v235_v8 = vld [vmem:[%s762_s11] sm:$0xff]  ;;  %v224_v12 = vld [vmem:[%s769_s14 + $0x8] sm:$0xff]  ;;  %v225_v13 = vld [vmem:[%s769_s14 + $0x10] sm:$0xff] }
  0x10   : > { %666 = vmatpush3.msra.mxu1 %v233_v3  ;;  %647 = vmatprep.subr.mxu0 %v244_v4  ;;  %v223_v11 = vld [vmem:[%s769_s14] sm:$0xff]  ;;  %v238_v14 = vld [vmem:[%s762_s11 + $0x18] sm:$0xff]  ;;  %v240_v18 = vld [vmem:[%s762_s11 + $0x28] sm:$0xff] }
  0x11   : > { %667 = vmatprep.subr.mxu1 %v232_v5  ;;  %648 = vmatpush3.msra.mxu0 %v244_v4  ;;  %v226_v15 = vld [vmem:[%s769_s14 + $0x18] sm:$0xff]  ;;  %v239_v16 = vld [vmem:[%s762_s11 + $0x20] sm:$0xff]  ;;  %v228_v19 = vld [vmem:[%s769_s14 + $0x28] sm:$0xff] }
  0x12   : > { %668 = vmatpush3.msra.mxu1 %v232_v5  ;;  %649 = vmatprep.subr.mxu0 %v243_v6  ;;  %v227_v17 = vld [vmem:[%s769_s14 + $0x20] sm:$0xff]  ;;  %v241_v20 = vld [vmem:[%s762_s11 + $0x30] sm:$0xff]  ;;  %v242_v22 = vld [vmem:[%s762_s11 + $0x38] sm:$0xff] }
  0x13   : > { %669 = vmatprep.subr.mxu1 %v231_v7  ;;  %650 = vmatpush3.msra.mxu0 %v243_v6  ;;  %v229_v21 = vld [vmem:[%s769_s14 + $0x30] sm:$0xff]  ;;  %v230_v23 = vld [vmem:[%s769_s14 + $0x38] sm:$0xff] }
  0x14   : > { %651 = vmatprep.mubr.msk.f32.mxu0 %vm247_vm0, %v235_v8  ;;  %670 = vmatpush3.msra.mxu1 %v231_v7 }
  0x15   : > { %671 = vmatprep.mubr.msk.f32.mxu1 %vm247_vm0, %v223_v11  ;;  %652 = vmatmul.mubr.msk.f32.vlgmr.msra.gmra.mxu0 %vm247_vm0, %v236_v9 }
  0x16   : > { %672 = vmatmul.mubr.msk.f32.vlgmr.msra.gmra.mxu1 %vm247_vm0, %v224_v12  ;;  %654 = vmatprep.mubr.msk.f32.mxu0 %vm247_vm0, %v237_v10 }
  0x17   : > { %674 = vmatprep.mubr.msk.f32.mxu1 %vm247_vm0, %v225_v13 }
  0x19   : > { %655 = vmatmul.mubr.msk.f32.gmra.mxu0 %vm247_vm0, %v238_v14 }
  0x1a   : > { %675 = vmatmul.mubr.msk.f32.gmra.mxu1 %vm247_vm0, %v226_v15  ;;  %657 = vmatprep.mubr.msk.f32.mxu0 %vm247_vm0, %v239_v16 }
  0x1b   : > { %677 = vmatprep.mubr.msk.f32.mxu1 %vm247_vm0, %v227_v17 }
  0x1d   : > { %658 = vmatmul.mubr.msk.f32.gmra.mxu0 %vm247_vm0, %v240_v18 }
  0x1e   : > { %678 = vmatmul.mubr.msk.f32.gmra.mxu1 %vm247_vm0, %v228_v19  ;;  %660 = vmatprep.mubr.msk.f32.mxu0 %vm247_vm0, %v241_v20 }
  0x1f   : > { %680 = vmatprep.mubr.msk.f32.mxu1 %vm247_vm0, %v229_v21 }
  0x21   : > { %661 = vmatmul.mubr.msk.f32.gmra.mxu0 %vm247_vm0, %v242_v22 }
  0x22   : > { %681 = vmatmul.mubr.msk.f32.gmra.mxu1 %vm247_vm0, %v230_v23 }
  0xd5   : > { %v653_v24 = vpop.f32.mrf.mxu0 }
  0xd6   : > { %v673_v25 = vpop.f32.mrf.mxu1 }
  0xd7   : > { %v473_v26 = vadd.f32 %v673_v25, %v653_v24  ;;  %v338_v27 = vpop.f32.mrf.mxu0 }
  0xd8   : > { %v467_v28 = vpop.f32.mrf.mxu1 }
  0xd9   : > { %v507_v29 = vmax.f32 %v473_v26, 0.0  ;;  %v468_v30 = vadd.f32 %v467_v28, %v338_v27  ;;  %v656_v31 = vpop.f32.mrf.mxu0 }
  0xda   : > { %v676_v32 = vpop.f32.mrf.mxu1 }
  0xdb   : > { %515 = vst.msk [vmem:[%s806_s18 + $0x8] sm:$0xff] %vm247_vm0, %v507_v29  ;;  %v506_v33 = vmax.f32 %v468_v30, 0.0  ;;  %v483_v34 = vadd.f32 %v676_v32, %v656_v31  ;;  %v348_v35 = vpop.f32.mrf.mxu0 }
  0xdc   : > { %v477_v36 = vpop.f32.mrf.mxu1 }
  0xdd   : > { %514 = vst.msk [vmem:[%s806_s18] sm:$0xff] %vm247_vm0, %v506_v33  ;;  %v509_v37 = vmax.f32 %v483_v34, 0.0  ;;  %v478_v38 = vadd.f32 %v477_v36, %v348_v35  ;;  %v659_v39 = vpop.f32.mrf.mxu0 }
  0xde   : > { %v679_v40 = vpop.f32.mrf.mxu1 }
  0xdf   : > { %517 = vst.msk [vmem:[%s806_s18 + $0x18] sm:$0xff] %vm247_vm0, %v509_v37  ;;  %v508_v41 = vmax.f32 %v478_v38, 0.0  ;;  %v493_v42 = vadd.f32 %v679_v40, %v659_v39  ;;  %v358_v43 = vpop.f32.mrf.mxu0 }
  0xe0   : > { %v487_v44 = vpop.f32.mrf.mxu1 }
  0xe1   : > { %516 = vst.msk [vmem:[%s806_s18 + $0x10] sm:$0xff] %vm247_vm0, %v508_v41  ;;  %v511_v45 = vmax.f32 %v493_v42, 0.0  ;;  %v488_v46 = vadd.f32 %v487_v44, %v358_v43  ;;  %v662_v47 = vpop.f32.mrf.mxu0 }
  0xe2   : > { %v682_v48 = vpop.f32.mrf.mxu1 }
  0xe3   : > { %519 = vst.msk [vmem:[%s806_s18 + $0x28] sm:$0xff] %vm247_vm0, %v511_v45  ;;  %v510_v49 = vmax.f32 %v488_v46, 0.0  ;;  %v503_v50 = vadd.f32 %v682_v48, %v662_v47  ;;  %v368_v51 = vpop.f32.mrf.mxu0 }
  0xe4   : > { %v497_v52 = vpop.f32.mrf.mxu1 }
  0xe5   : > { %518 = vst.msk [vmem:[%s806_s18 + $0x20] sm:$0xff] %vm247_vm0, %v510_v49  ;;  %v513_v53 = vmax.f32 %v503_v50, 0.0  ;;  %v498_v54 = vadd.f32 %v497_v52, %v368_v51 }
  0xe7   : > { %521 = vst.msk [vmem:[%s806_s18 + $0x38] sm:$0xff] %vm247_vm0, %v513_v53  ;;  %v512_v55 = vmax.f32 %v498_v54, 0.0 }
  0xe9   : > { %520 = vst.msk [vmem:[%s806_s18 + $0x30] sm:$0xff] %vm247_vm0, %v512_v55 }
  0xea PF: > { %s14_s15 = sadd.s32 1, %s697_s15  }
  0xeb   : > { %p11_p4 = scmp.ge.s32.totalorder %s14_s15, 6  }
  0xed   :  { %13 = sbr.rel (!%p11_p4) target bundleno = 1 (0x1), region = 69 }

</bundles_post_ra>
